<compile_context>
chip_gen: v7x
topology: tpu7x:2x2x1
jax: 0.10.0
libtpu: 0.0.40
codegen_flags: <defaults>
</compile_context>

<pallas_src>
import functools

import jax
import jax.numpy as jnp
from jax.experimental import pallas as pl
from jax.experimental.pallas import tpu as pltpu


def _pad16(n):
    return ((n + 15) // 16) * 16


def _pad128(n):
    return ((n + 127) // 128) * 128


K_IN = 128      # rows of the fused input weight block == padded [x|SE|deg] width
EDGE_OFF = 128  # lane offset of the lin_edge columns inside the fused block


def _slab_layout(H, in_node, in_edge, fg):
    """Static row/lane offsets of the packed bf16 weight slab (16-row aligned)."""
    assert in_node + in_edge + 1 <= K_IN, "fused input block overflows 128 rows"
    assert 2 * H <= EDGE_OFF, "need 2H <= 128 so [wm1|ws1] stays in lane tile 0"
    r_hid = K_IN                        # rows 128:128+H  -> [wm2 | wm3]
    r_wc = r_hid + _pad16(H)            # rows 160:160+H  -> wc_top (pooled half)
    r_wg = r_wc + _pad16(H)             # rows 192:192+fg -> wg @ wc_bot (fc_graph folded)
    total = r_wg + _pad16(fg)           # 208
    lanes = EDGE_OFF + _pad128(3 * H)   # 256
    return dict(r_hid=r_hid, r_wc=r_wc, r_wg=r_wg, wg_rows=_pad16(fg),
                total=total, lanes=lanes, b_lanes=max(_pad128(2 * H), 128))


def _linear_params(key, fan_in, fan_out):
    # PyTorch Linear default init: U(-1/sqrt(fan_in), 1/sqrt(fan_in)).
    kw, kb = jax.random.split(key)
    bound = 1.0 / jnp.sqrt(jnp.float32(fan_in))
    w = jax.random.uniform(kw, (fan_in, fan_out), jnp.float32, -bound, bound)
    b = jax.random.uniform(kb, (1, fan_out), jnp.float32, -bound, bound)
    return w, b  # w stored pre-transposed: x @ w


def init_gnn_params(key, hidden_channels, num_graph_features,
                    in_node_channels=84, in_edge_channels=6):
    H = hidden_channels
    keys = jax.random.split(key, 16)
    p = {}
    p["wm1"], p["bm1"] = _linear_params(keys[0], in_node_channels, H)
    p["we1"], p["be1"] = _linear_params(keys[1], in_edge_channels, H)
    p["ws1"], p["bs1"] = _linear_params(keys[2], in_node_channels, H)
    p["wm2"], p["bm2"] = _linear_params(keys[3], H, H)
    p["we2"], p["be2"] = _linear_params(keys[4], in_edge_channels, H)
    p["wm3"], p["bm3"] = _linear_params(keys[5], H, H)
    p["we3"], p["be3"] = _linear_params(keys[6], in_edge_channels, H)
    # conv4 exists in the module but its output (x4) is never used downstream,
    # so its parameters are initialized (module-faithful) yet never packed/shipped.
    p["wm4"], p["bm4"] = _linear_params(keys[7], H, H)
    p["we4"], p["be4"] = _linear_params(keys[8], in_edge_channels, H)
    p["wg"], p["bg"] = _linear_params(keys[9], num_graph_features, H)
    p["wc"], p["bc"] = _linear_params(keys[10], 2 * H, H)
    p["wl"], p["bl"] = _linear_params(keys[11], H, 1)
    return p


def pack_gnn_params(p, hidden_channels, in_node=84, in_edge=6, fg=8):
    """Pack all live weights into one bf16 slab and all biases into one f32 slab."""
    H = hidden_channels
    L = _slab_layout(H, in_node, in_edge, fg)
    W = jnp.zeros((L["total"], L["lanes"]), jnp.float32)

    # Fused input block (rows 0:128): conv1 [lin_msg|lin_self] + conv1..3 lin_edge.
    W = W.at[0:in_node, 0:H].set(p["wm1"])
    W = W.at[0:in_node, H:2 * H].set(p["ws1"])
    we_cat = jnp.concatenate([p["we1"], p["we2"], p["we3"]], axis=1)   # [in_edge, 3H]
    be_cat = jnp.concatenate([p["be1"], p["be2"], p["be3"]], axis=1)   # [1, 3H]
    W = W.at[in_node:in_node + in_edge, EDGE_OFF:EDGE_OFF + 3 * H].set(we_cat)
    W = W.at[in_node + in_edge, EDGE_OFF:EDGE_OFF + 3 * H].set(be_cat[0])  # bias via deg col

    # Hidden block: conv2/conv3 lin_msg.
    W = W.at[L["r_hid"]:L["r_hid"] + H, 0:H].set(p["wm2"])
    W = W.at[L["r_hid"]:L["r_hid"] + H, H:2 * H].set(p["wm3"])

    # Head: fc_combined top half (pooled path) and fc_graph folded through bottom half.
    wc = p["wc"]                                                       # [2H, H]
    W = W.at[L["r_wc"]:L["r_wc"] + H, 0:H].set(wc[:H])
    W = W.at[L["r_wg"]:L["r_wg"] + fg, 0:H].set(p["wg"] @ wc[H:])

    B = jnp.zeros((8, L["b_lanes"]), jnp.float32)
    B = B.at[0, 0:H].set(p["bm1"][0]).at[0, H:2 * H].set(p["bs1"][0])
    B = B.at[1, 0:H].set(p["bm2"][0]).at[1, H:2 * H].set(p["bm3"][0])
    B = B.at[2, 0:H].set((p["bg"] @ wc[H:] + p["bc"])[0])              # head bias
    B = B.at[3, 0:H].set(p["wl"][:, 0])                                # final Linear row
    B = B.at[4, 0].set(p["bl"][0, 0])
    return W.astype(jnp.bfloat16), B


@functools.partial(jax.jit, static_argnames=("num_graphs", "hidden_channels"))
def gnn_forward(w_slab, b_slab, x, edge_index, edge_attr, batch, graph_attr,
                num_graphs, hidden_channels):
    """Eval-mode forward of the PyTorch GNN (dropout_adj / F.dropout = identity)."""
    f32, bf16 = jnp.float32, jnp.bfloat16
    N, in_node = x.shape
    in_edge = edge_attr.shape[1]
    fg = graph_attr.shape[1]
    H = hidden_channels
    G = num_graphs
    L = _slab_layout(H, in_node, in_edge, fg)
    r_hid, r_wc, r_wg, wg_rows = L["r_hid"], L["r_wc"], L["r_wg"], L["wg_rows"]

    a_lanes = _pad128(N)            # A segment lane width (A starts at lane 128 of ncat)
    ga_off = _pad16(N)              # graph_attr lane offset inside gcat / scratch row offset
    gk = 128                        # head contraction width (gcat lanes, scratch rows)
    assert N <= gk and ga_off + max(fg, wg_rows) <= gk
    Gp = max(((G + 7) // 8) * 8, 8)

    # ---- plain-JAX glue (fused inside this jit): densify graph structure.
    # TODO(synk): for large N (> ~2-3k on v7x's 64 MiB VMEM), pass A separately,
    # tile its rows via a grid axis (or scalar-prefetch edge lists with manual
    # DMA) instead of this single-block dense form; at these tiny sizes the
    # single block is latency-optimal.
    src, dst = edge_index[0], edge_index[1]
    A = jnp.zeros((N, N), f32).at[dst, src].add(1.0)             # A[i,j] = #edges j->i
    SE = jnp.zeros((N, in_edge), f32).at[dst].add(edge_attr)     # segment-sum of edge_attr
    deg = jnp.zeros((N, 1), f32).at[dst, 0].add(1.0)             # in-degree
    front = jnp.concatenate([x.astype(f32), SE, deg], axis=1)    # [N, in_node+in_edge+1]
    front = jnp.pad(front, ((0, 0), (0, K_IN - front.shape[1])))
    A_pad = jnp.pad(A, ((0, 0), (0, a_lanes - N)))
    # bf16 MXU operands are prepared here (no in-kernel input casts).
    ncat = jnp.concatenate([front, A_pad], axis=1).astype(bf16)  # [N, 128 + a_lanes]

    onehot = (batch[None, :] == jnp.arange(G)[:, None]).astype(f32)
    P = onehot / jnp.maximum(onehot.sum(axis=1, keepdims=True), 1.0)   # mean-pool matrix
    gcat = jnp.zeros((Gp, gk), f32)
    gcat = gcat.at[:G, 0:N].set(P)
    gcat = gcat.at[:G, ga_off:ga_off + fg].set(graph_attr.astype(f32))
    gcat = gcat.astype(bf16)                                           # [Gp, 128]

    def kernel(ncat_ref, gcat_ref, w_ref, b_ref, out_ref, head_scr):
        def mm(a, b):
            return jnp.dot(a, b, preferred_element_type=f32)

        # ONE MXU pass fuses conv1's [lin_msg|lin_self] and conv1..3's lin_edge
        # (per-layer edge bias folded in through the deg column).
        fused = mm(ncat_ref[:, 0:K_IN], w_ref[0:K_IN, :])               # [N, 256] f32
        xw = fused[:, 0:2 * H]                                          # [x@wm1 | x@ws1]
        edge_all = fused[:, EDGE_OFF:EDGE_OFF + 3 * H]                  # SE@we + deg*be, 3 layers
        Ad = ncat_ref[:, K_IN:K_IN + N]                                 # [N, N] bf16, lane-aligned

        # conv1
        msg1 = xw[:, 0:H] + b_ref[0:1, 0:H]
        self1 = xw[:, H:2 * H] + b_ref[0:1, H:2 * H]
        x1 = jnp.maximum(mm(Ad, msg1.astype(bf16)) + edge_all[:, 0:H] + self1, 0.0)

        # conv2 / conv3: lin_self is Identity (in_channels == out_channels).
        msg2 = mm(x1.astype(bf16), w_ref[r_hid:r_hid + H, 0:H]) + b_ref[1:2, 0:H]
        x2 = jnp.maximum(mm(Ad, msg2.astype(bf16)) + edge_all[:, H:2 * H] + x1, 0.0) + x1
        msg3 = mm(x2.astype(bf16), w_ref[r_hid:r_hid + H, H:2 * H]) + b_ref[1:2, H:2 * H]
        x3 = jnp.maximum(mm(Ad, msg3.astype(bf16)) + edge_all[:, 2 * H:3 * H] + x2, 0.0) + x2
        # conv4's output (x4) is dead in the reference module -> not computed.

        # Head in two MXU passes:
        #   t = x3 @ wc_top, then [P | graph_attr] @ [t ; wg@wc_bot] assembled in scratch.
        t = mm(x3.astype(bf16), w_ref[r_wc:r_wc + H, 0:H])              # [N, H] f32
        head_scr[...] = jnp.zeros_like(head_scr)
        head_scr[0:N, 0:H] = t.astype(bf16)
        head_scr[ga_off:ga_off + wg_rows, 0:H] = w_ref[r_wg:r_wg + wg_rows, 0:H]
        comb = mm(gcat_ref[...], head_scr[...])                          # [Gp, 128] f32
        comb = jnp.maximum(comb[:, 0:H] + b_ref[2:3, 0:H], 0.0)
        # F.dropout: identity in eval mode.
        # Final Linear(H, 1) as a VPU multiply + lane reduction (no 1-lane MXU pass).
        final = (jnp.sum(comb * b_ref[3:4, 0:H], axis=-1, keepdims=True)
                 + b_ref[4:5, 0:1])
        out_ref[...] = jnp.broadcast_to(final, out_ref.shape)            # lane-dense store

    # Advisory cost so XLA overlaps the call with the scatter-add glue.
    flops = (2 * N * K_IN * L["lanes"]        # fused input / lin_edge pass
             + 3 * 2 * N * N * H              # three A @ msg aggregations
             + 2 * 2 * N * H * H              # msg2, msg3
             + 2 * N * H * H                  # x3 @ wc_top
             + 2 * Gp * gk * 128)             # fused head matmul
    bytes_accessed = (N * (K_IN + a_lanes) * 2 + Gp * gk * 2
                      + L["total"] * L["lanes"] * 2 + 8 * L["b_lanes"] * 4
                      + Gp * 128 * 4)

    vmem = pl.BlockSpec(memory_space=pltpu.MemorySpace.VMEM)
    out = pl.pallas_call(
        kernel,
        out_shape=jax.ShapeDtypeStruct((Gp, 128), f32),
        in_specs=[vmem, vmem, vmem, vmem],
        out_specs=vmem,
        scratch_shapes=[pltpu.VMEM((gk, 128), bf16)],
        cost_estimate=pl.CostEstimate(flops=flops, transcendentals=0,
                                      bytes_accessed=bytes_accessed),
    )(ncat, gcat, w_slab, b_slab)
    # TODO(synk): when serving many independent graph-batches on v7x, add a
    # leading batch grid axis with dimension_semantics=("parallel", ...) so
    # both TensorCores are used (v5e/v6e are single-TC, no-op there).
    return out[:G, :1]


def _reference_forward(params, x, edge_index, edge_attr, batch, graph_attr, G):
    # Faithful f32 dense formulation of the PyTorch eval-mode forward.
    N = x.shape[0]
    src, dst = edge_index[0], edge_index[1]
    A = jnp.zeros((N, N), jnp.float32).at[dst, src].add(1.0)
    S = (dst[None, :] == jnp.arange(N)[:, None]).astype(jnp.float32)
    onehot = (batch[None, :] == jnp.arange(G)[:, None]).astype(jnp.float32)
    P = onehot / jnp.maximum(onehot.sum(1, keepdims=True), 1.0)
    p = params

    def agg(xin, wm, bm, we, be):
        return A @ (xin @ wm + bm) + S @ (edge_attr @ we + be)

    x1 = jax.nn.relu(agg(x, p["wm1"], p["bm1"], p["we1"], p["be1"])
                     + x @ p["ws1"] + p["bs1"])
    x2 = jax.nn.relu(agg(x1, p["wm2"], p["bm2"], p["we2"], p["be2"]) + x1) + x1
    x3 = jax.nn.relu(agg(x2, p["wm3"], p["bm3"], p["we3"], p["be3"]) + x2) + x2
    pooled = P @ x3
    gfeat = graph_attr @ p["wg"] + p["bg"]
    comb = jax.nn.relu(jnp.concatenate([pooled, gfeat], axis=1) @ p["wc"] + p["bc"])
    return comb @ p["wl"] + p["bl"]


if __name__ == "__main__":
    H = 32              # hidden_channels
    FG = 8              # num_graph_features
    N = 16              # nodes
    E = 24              # edges
    G = 2               # graphs in batch
    IN_NODE = 84        # fixed by the module (conv1 in_channels)
    IN_EDGE = 6

    key = jax.random.PRNGKey(0)
    kx, ke, ki, kg, kp = jax.random.split(key, 5)

    x = jax.random.normal(kx, (N, IN_NODE), jnp.float32)
    edge_attr = jax.random.normal(ke, (E, IN_EDGE), jnp.float32)
    edge_index = jax.random.randint(ki, (2, E), 0, N, jnp.int32)
    batch = jnp.concatenate([jnp.zeros(N // 2, jnp.int32),
                             jnp.ones(N - N // 2, jnp.int32)])
    graph_attr = jax.random.normal(kg, (G, FG), jnp.float32)

    params = init_gnn_params(kp, H, FG, IN_NODE, IN_EDGE)
    w_slab, b_slab = pack_gnn_params(params, H, IN_NODE, IN_EDGE, FG)

    out = gnn_forward(w_slab, b_slab, x, edge_index, edge_attr, batch, graph_attr,
                      num_graphs=G, hidden_channels=H)
    out = jax.block_until_ready(out)

    ref = _reference_forward(params, x, edge_index, edge_attr, batch,
                             graph_attr, G)
    assert out.shape == (G, 1)
    # Kernel uses bf16 MXU operands with f32 accumulation (standard TPU mixed
    # precision); A/P entries are exact in bf16 at these sizes, edge/graph
    # features and the host-folded wg@wc_bot carry bf16 rounding -> compare
    # against the full-f32 reference at bf16-level tolerance.
    assert jnp.allclose(out, ref, atol=5e-2, rtol=5e-2), (out, ref)

    # TODO(synk): dropout_adj / F.dropout are stochastic in training mode;
    # this kernel implements eval-mode (identity) semantics.
    print("KERNEL_OK")
</pallas_src>

<mosaic_0001>
module attributes {stable_mosaic.version = 11 : i64} {
  func.func @kernel(%arg0: memref<16x256xbf16, #tpu.memory_space<vmem>>, %arg1: memref<8x128xbf16, #tpu.memory_space<vmem>>, %arg2: memref<208x256xbf16, #tpu.memory_space<vmem>>, %arg3: memref<8x128xf32, #tpu.memory_space<vmem>>, %arg4: memref<8x128xf32, #tpu.memory_space<vmem>>, %arg5: memref<128x128xbf16, #tpu.memory_space<vmem>>) attributes {dimension_semantics = [], scalar_prefetch = 0 : i64, scratch_operands = 1 : i64, tpu.core_type = #tpu.core_type<tc>} {
    %c0 = arith.constant 0 : index
    %c0_0 = arith.constant 0 : index
    %0 = vector.load %arg0[%c0, %c0_0] : memref<16x256xbf16, #tpu.memory_space<vmem>>, vector<16x128xbf16>
    %c0_1 = arith.constant 0 : index
    %c0_2 = arith.constant 0 : index
    %1 = vector.load %arg2[%c0_1, %c0_2] : memref<208x256xbf16, #tpu.memory_space<vmem>>, vector<128x256xbf16>
    %cst = arith.constant dense<0.000000e+00> : vector<16x256xf32>
    %2 = tpu.matmul %0, %1, %cst {dimension_numbers = #tpu.dot_dimension_numbers<[1], [0], [0], [1], [0, 0, 1, 1], [], []>} : vector<16x128xbf16>, vector<128x256xbf16>, vector<16x256xf32> -> vector<16x256xf32>
    %3 = vector.extract_strided_slice %2 {offsets = [0, 0], sizes = [16, 64], strides = [1, 1]} : vector<16x256xf32> to vector<16x64xf32>
    %4 = vector.extract_strided_slice %2 {offsets = [0, 128], sizes = [16, 96], strides = [1, 1]} : vector<16x256xf32> to vector<16x96xf32>
    %c0_3 = arith.constant 0 : index
    %c128 = arith.constant 128 : index
    %5 = vector.load %arg0[%c0_3, %c128] : memref<16x256xbf16, #tpu.memory_space<vmem>>, vector<16x16xbf16>
    %6 = vector.extract_strided_slice %3 {offsets = [0, 0], sizes = [16, 32], strides = [1, 1]} : vector<16x64xf32> to vector<16x32xf32>
    %c0_4 = arith.constant 0 : index
    %c0_5 = arith.constant 0 : index
    %7 = vector.load %arg3[%c0_4, %c0_5] : memref<8x128xf32, #tpu.memory_space<vmem>>, vector<1x32xf32>
    %8 = vector.broadcast %7 : vector<1x32xf32> to vector<16x32xf32>
    %9 = arith.addf %6, %8 : vector<16x32xf32>
    %10 = vector.extract_strided_slice %3 {offsets = [0, 32], sizes = [16, 32], strides = [1, 1]} : vector<16x64xf32> to vector<16x32xf32>
    %c0_6 = arith.constant 0 : index
    %c32 = arith.constant 32 : index
    %11 = vector.load %arg3[%c0_6, %c32] : memref<8x128xf32, #tpu.memory_space<vmem>>, vector<1x32xf32>
    %12 = vector.broadcast %11 : vector<1x32xf32> to vector<16x32xf32>
    %13 = arith.addf %10, %12 : vector<16x32xf32>
    %14 = arith.truncf %9 : vector<16x32xf32> to vector<16x32xbf16>
    %cst_7 = arith.constant dense<0.000000e+00> : vector<16x32xf32>
    %15 = tpu.matmul %5, %14, %cst_7 {dimension_numbers = #tpu.dot_dimension_numbers<[1], [0], [0], [1], [0, 0, 1, 1], [], []>} : vector<16x16xbf16>, vector<16x32xbf16>, vector<16x32xf32> -> vector<16x32xf32>
    %16 = vector.extract_strided_slice %4 {offsets = [0, 0], sizes = [16, 32], strides = [1, 1]} : vector<16x96xf32> to vector<16x32xf32>
    %17 = arith.addf %15, %16 : vector<16x32xf32>
    %18 = arith.addf %17, %13 : vector<16x32xf32>
    %cst_8 = arith.constant 0.000000e+00 : f32
    %19 = vector.broadcast %cst_8 : f32 to vector<16x32xf32>
    %20 = arith.maximumf %18, %19 : vector<16x32xf32>
    %21 = arith.truncf %20 : vector<16x32xf32> to vector<16x32xbf16>
    %c128_9 = arith.constant 128 : index
    %c0_10 = arith.constant 0 : index
    %22 = vector.load %arg2[%c128_9, %c0_10] : memref<208x256xbf16, #tpu.memory_space<vmem>>, vector<32x32xbf16>
    %cst_11 = arith.constant dense<0.000000e+00> : vector<16x32xf32>
    %23 = tpu.matmul %21, %22, %cst_11 {dimension_numbers = #tpu.dot_dimension_numbers<[1], [0], [0], [1], [0, 0, 1, 1], [], []>} : vector<16x32xbf16>, vector<32x32xbf16>, vector<16x32xf32> -> vector<16x32xf32>
    %c1 = arith.constant 1 : index
    %c0_12 = arith.constant 0 : index
    %24 = vector.load %arg3[%c1, %c0_12] : memref<8x128xf32, #tpu.memory_space<vmem>>, vector<1x32xf32>
    %25 = vector.broadcast %24 : vector<1x32xf32> to vector<16x32xf32>
    %26 = arith.addf %23, %25 : vector<16x32xf32>
    %27 = arith.truncf %26 : vector<16x32xf32> to vector<16x32xbf16>
    %cst_13 = arith.constant dense<0.000000e+00> : vector<16x32xf32>
    %28 = tpu.matmul %5, %27, %cst_13 {dimension_numbers = #tpu.dot_dimension_numbers<[1], [0], [0], [1], [0, 0, 1, 1], [], []>} : vector<16x16xbf16>, vector<16x32xbf16>, vector<16x32xf32> -> vector<16x32xf32>
    %29 = vector.extract_strided_slice %4 {offsets = [0, 32], sizes = [16, 32], strides = [1, 1]} : vector<16x96xf32> to vector<16x32xf32>
    %30 = arith.addf %28, %29 : vector<16x32xf32>
    %31 = arith.addf %30, %20 : vector<16x32xf32>
    %cst_14 = arith.constant 0.000000e+00 : f32
    %32 = vector.broadcast %cst_14 : f32 to vector<16x32xf32>
    %33 = arith.maximumf %31, %32 : vector<16x32xf32>
    %34 = arith.addf %33, %20 : vector<16x32xf32>
    %35 = arith.truncf %34 : vector<16x32xf32> to vector<16x32xbf16>
    %c128_15 = arith.constant 128 : index
    %c32_16 = arith.constant 32 : index
    %36 = vector.load %arg2[%c128_15, %c32_16] : memref<208x256xbf16, #tpu.memory_space<vmem>>, vector<32x32xbf16>
    %cst_17 = arith.constant dense<0.000000e+00> : vector<16x32xf32>
    %37 = tpu.matmul %35, %36, %cst_17 {dimension_numbers = #tpu.dot_dimension_numbers<[1], [0], [0], [1], [0, 0, 1, 1], [], []>} : vector<16x32xbf16>, vector<32x32xbf16>, vector<16x32xf32> -> vector<16x32xf32>
    %c1_18 = arith.constant 1 : index
    %c32_19 = arith.constant 32 : index
    %38 = vector.load %arg3[%c1_18, %c32_19] : memref<8x128xf32, #tpu.memory_space<vmem>>, vector<1x32xf32>
    %39 = vector.broadcast %38 : vector<1x32xf32> to vector<16x32xf32>
    %40 = arith.addf %37, %39 : vector<16x32xf32>
    %41 = arith.truncf %40 : vector<16x32xf32> to vector<16x32xbf16>
    %cst_20 = arith.constant dense<0.000000e+00> : vector<16x32xf32>
    %42 = tpu.matmul %5, %41, %cst_20 {dimension_numbers = #tpu.dot_dimension_numbers<[1], [0], [0], [1], [0, 0, 1, 1], [], []>} : vector<16x16xbf16>, vector<16x32xbf16>, vector<16x32xf32> -> vector<16x32xf32>
    %43 = vector.extract_strided_slice %4 {offsets = [0, 64], sizes = [16, 32], strides = [1, 1]} : vector<16x96xf32> to vector<16x32xf32>
    %44 = arith.addf %42, %43 : vector<16x32xf32>
    %45 = arith.addf %44, %34 : vector<16x32xf32>
    %cst_21 = arith.constant 0.000000e+00 : f32
    %46 = vector.broadcast %cst_21 : f32 to vector<16x32xf32>
    %47 = arith.maximumf %45, %46 : vector<16x32xf32>
    %48 = arith.addf %47, %34 : vector<16x32xf32>
    %49 = arith.truncf %48 : vector<16x32xf32> to vector<16x32xbf16>
    %c160 = arith.constant 160 : index
    %c0_22 = arith.constant 0 : index
    %50 = vector.load %arg2[%c160, %c0_22] : memref<208x256xbf16, #tpu.memory_space<vmem>>, vector<32x32xbf16>
    %cst_23 = arith.constant dense<0.000000e+00> : vector<16x32xf32>
    %51 = tpu.matmul %49, %50, %cst_23 {dimension_numbers = #tpu.dot_dimension_numbers<[1], [0], [0], [1], [0, 0, 1, 1], [], []>} : vector<16x32xbf16>, vector<32x32xbf16>, vector<16x32xf32> -> vector<16x32xf32>
    %cst_24 = arith.constant 0.000000e+00 : bf16
    %52 = vector.broadcast %cst_24 : bf16 to vector<128x128xbf16>
    %c0_25 = arith.constant 0 : index
    %c0_26 = arith.constant 0 : index
    %53 = vector.load %arg5[%c0_25, %c0_26] : memref<128x128xbf16, #tpu.memory_space<vmem>>, vector<128x128xbf16>
    tpu.vector_store %arg5[%c0_25, %c0_26], %52 {strides = array<i32>} : memref<128x128xbf16, #tpu.memory_space<vmem>>, vector<128x128xbf16>,
    %54 = arith.truncf %51 : vector<16x32xf32> to vector<16x32xbf16>
    %c0_27 = arith.constant 0 : index
    %c0_28 = arith.constant 0 : index
    %55 = vector.load %arg5[%c0_27, %c0_28] : memref<128x128xbf16, #tpu.memory_space<vmem>>, vector<16x32xbf16>
    tpu.vector_store %arg5[%c0_27, %c0_28], %54 {strides = array<i32>} : memref<128x128xbf16, #tpu.memory_space<vmem>>, vector<16x32xbf16>,
    %c192 = arith.constant 192 : index
    %c0_29 = arith.constant 0 : index
    %56 = vector.load %arg2[%c192, %c0_29] : memref<208x256xbf16, #tpu.memory_space<vmem>>, vector<16x32xbf16>
    %c16 = arith.constant 16 : index
    %c0_30 = arith.constant 0 : index
    %57 = vector.load %arg5[%c16, %c0_30] : memref<128x128xbf16, #tpu.memory_space<vmem>>, vector<16x32xbf16>
    tpu.vector_store %arg5[%c16, %c0_30], %56 {strides = array<i32>} : memref<128x128xbf16, #tpu.memory_space<vmem>>, vector<16x32xbf16>,
    %c0_31 = arith.constant 0 : index
    %c0_32 = arith.constant 0 : index
    %58 = vector.load %arg1[%c0_31, %c0_32] : memref<8x128xbf16, #tpu.memory_space<vmem>>, vector<8x128xbf16>
    %c0_33 = arith.constant 0 : index
    %c0_34 = arith.constant 0 : index
    %59 = vector.load %arg5[%c0_33, %c0_34] : memref<128x128xbf16, #tpu.memory_space<vmem>>, vector<128x128xbf16>
    %cst_35 = arith.constant dense<0.000000e+00> : vector<8x128xf32>
    %60 = tpu.matmul %58, %59, %cst_35 {dimension_numbers = #tpu.dot_dimension_numbers<[1], [0], [0], [1], [0, 0, 1, 1], [], []>} : vector<8x128xbf16>, vector<128x128xbf16>, vector<8x128xf32> -> vector<8x128xf32>
    %61 = vector.extract_strided_slice %60 {offsets = [0, 0], sizes = [8, 32], strides = [1, 1]} : vector<8x128xf32> to vector<8x32xf32>
    %c2 = arith.constant 2 : index
    %c0_36 = arith.constant 0 : index
    %62 = vector.load %arg3[%c2, %c0_36] : memref<8x128xf32, #tpu.memory_space<vmem>>, vector<1x32xf32>
    %63 = vector.broadcast %62 : vector<1x32xf32> to vector<8x32xf32>
    %64 = arith.addf %61, %63 : vector<8x32xf32>
    %cst_37 = arith.constant 0.000000e+00 : f32
    %65 = vector.broadcast %cst_37 : f32 to vector<8x32xf32>
    %66 = arith.maximumf %64, %65 : vector<8x32xf32>
    %c3 = arith.constant 3 : index
    %c0_38 = arith.constant 0 : index
    %67 = vector.load %arg3[%c3, %c0_38] : memref<8x128xf32, #tpu.memory_space<vmem>>, vector<1x32xf32>
    %68 = vector.broadcast %67 : vector<1x32xf32> to vector<8x32xf32>
    %69 = arith.mulf %66, %68 : vector<8x32xf32>
    %cst_39 = arith.constant dense<0.000000e+00> : vector<8xf32>
    %70 = vector.multi_reduction <add>, %69, %cst_39 [1] : vector<8x32xf32> to vector<8xf32>
    %71 = vector.shape_cast %70 : vector<8xf32> to vector<8x1xf32>
    %c4 = arith.constant 4 : index
    %c0_40 = arith.constant 0 : index
    %72 = vector.load %arg3[%c4, %c0_40] : memref<8x128xf32, #tpu.memory_space<vmem>>, vector<1x1xf32>
    %73 = vector.broadcast %72 : vector<1x1xf32> to vector<8x1xf32>
    %74 = arith.addf %71, %73 : vector<8x1xf32>
    %75 = vector.shape_cast %74 : vector<8x1xf32> to vector<8x1xf32>
    %76 = vector.broadcast %75 : vector<8x1xf32> to vector<8x128xf32>
    %c0_41 = arith.constant 0 : index
    %c0_42 = arith.constant 0 : index
    %77 = vector.load %arg4[%c0_41, %c0_42] : memref<8x128xf32, #tpu.memory_space<vmem>>, vector<8x128xf32>
    tpu.vector_store %arg4[%c0_41, %c0_42], %76 {strides = array<i32>} : memref<8x128xf32, #tpu.memory_space<vmem>>, vector<8x128xf32>,
    return
  }
}

</mosaic_0001>

<bundles_post_ra>
// kernel: gnn_forward.1
= control target key start
LH: loop header
LB: loop body
LE: loop exit
PB: predicated region body
PF: predicated region fallthrough
CT: control target
= control target key end

     0   :  { %v787_v1 = vmov 0   ;;  %v788_v18 = vmov 0.0   ;;  %vm789_vm0 = vmmov 0   ;;  %s790_s25 = smov 96   ;;  %vm180_vm1 = vcmask 130048   ;;  %s791_s7 = smov 64   ;;  %s962_s2 = inlined_call_operand.vmem [shape: bf16[208,256], index: 2, kind: input, shape index: {}]   ;;  %s963_s0 = inlined_call_operand.vmem [shape: bf16[16,256], index: 0, kind: input, shape index: {}]   ;;  %s964_s3 = inlined_call_operand.vmem [shape: f32[8,128], index: 3, kind: input, shape index: {}]   ;;  %s965_s1 = inlined_call_operand.vmem [shape: bf16[8,128], index: 1, kind: input, shape index: {}]   ;;  %s966_s4 = inlined_call_operand.vmem [shape: f32[8,128], index: 4, kind: output, shape index: {}]  }
   0x1   :  { %v756_v0 = vld [vmem:[%s962_s2 + $0x4] ss:$8 sps:$4 sm:$0xff]   ;;  %154 = vmatprep.mubr.bf16.mxu0 %v787_v1  ;;  %530 = vst [vmem:[#allocation2] sm:$0xff] %v787_v1  ;;  %531 = vst [vmem:[#allocation2 + $0x8] sm:$0xff] %v787_v1  ;;  %755 = vset.pattern.permute.xlu0 %v787_v1  ;;  %v758_v2 = vld [vmem:[%s962_s2] ss:$8 sps:$4 sm:$0xff]  }
   0x2   :  { %122 = vmatprep.subr.bf16.mxu0 %v756_v0  ;;  %v759_v3 = vld [vmem:[%s962_s2 + $0x14] ss:$8 sps:$4 sm:$0xff]   ;;  %v761_v4 = vld [vmem:[%s962_s2 + $0x10] ss:$8 sps:$4 sm:$0xff]   ;;  %v762_v5 = vld [vmem:[%s962_s2 + $0x24] ss:$8 sps:$4 sm:$0xff]   ;;  %702 = vmatprep.subr.bf16.mxu1 %v788_v18 }
   0x3   :  { %123 = vmatpush1.bf16.msra.mxu0 %v758_v2  ;;  %v764_v6 = vld [vmem:[%s962_s2 + $0x20] ss:$8 sps:$4 sm:$0xff]   ;;  %v765_v7 = vld [vmem:[%s962_s2 + $0x34] ss:$8 sps:$4 sm:$0xff]   ;;  %v767_v8 = vld [vmem:[%s962_s2 + $0x30] ss:$8 sps:$4 sm:$0xff]   ;;  %704 = vmatprep.mubr.msk.bf16.mxu1 %vm789_vm0, %v788_v18 }
   0x4   :  { %124 = vmatprep.subr.bf16.mxu0 %v759_v3  ;;  %v768_v9 = vld [vmem:[%s962_s2 + $0x44] ss:$8 sps:$4 sm:$0xff]   ;;  %v770_v10 = vld [vmem:[%s962_s2 + $0x40] ss:$8 sps:$4 sm:$0xff]   ;;  %v771_v11 = vld [vmem:[%s962_s2 + $0x54] ss:$8 sps:$4 sm:$0xff]  }
   0x5   :  { %v773_v12 = vld [vmem:[%s962_s2 + $0x50] ss:$8 sps:$4 sm:$0xff]   ;;  %v774_v13 = vld [vmem:[%s962_s2 + $0x64] ss:$8 sps:$4 sm:$0xff]   ;;  %v776_v14 = vld [vmem:[%s962_s2 + $0x60] ss:$8 sps:$4 sm:$0xff]  }
   0x6   :  { %v777_v15 = vld [vmem:[%s962_s2 + $0x74] ss:$8 sps:$4 sm:$0xff]   ;;  %v779_v16 = vld [vmem:[%s962_s2 + $0x70] ss:$8 sps:$4 sm:$0xff]   ;;  %v780_v17 = vld [vmem:[%s963_s0] ss:$8 sps:$4 sm:$0xff]  }
   0x7   :  { %125 = vmatpush1.bf16.msra.mxu0 %v761_v4  ;;  %v647_v19 = vld [vmem:[%s964_s3] ss:$0 sm:$0xff]  ;;  %v884_v27 = vld [vmem:[%s963_s0 + $0x4] ss:$8 sps:$4 sm:$0xff]   ;;  %v782_v28 = vld [vmem:[%s962_s2 + $0x90] ss:$8 sps:$4 sm:$0xff]  }
   0x8   :  { %126 = vmatprep.subr.bf16.mxu0 %v762_v5  ;;  %v783_v29 = vld [vmem:[%s962_s2 + $0x80] ss:$8 sps:$4 sm:$0xff]   ;;  %vm259_vm2 = vcmask 261120  }
   0x9   :  { %v650_v30 = vld [vmem:[%s964_s3 + $0x1] ss:$0 sm:$0xff] }
   0xa   :  { %v784_v31 = vld [vmem:[%s962_s2 + $0xc0] ss:$8 sps:$4 sm:$0xff]  }
   0xb   :  { %127 = vmatpush1.bf16.msra.mxu0 %v764_v6  ;;  %548 = vst.msk [vmem:[#allocation2 + $0x8] sm:$0xff] %vm259_vm2, %v784_v31 }
   0xc   :  { %128 = vmatprep.subr.bf16.mxu0 %v765_v7 }
   0xf   :  { %129 = vmatpush1.bf16.msra.mxu0 %v767_v8 }
  0x10   :  { %130 = vmatprep.subr.bf16.mxu0 %v768_v9 }
  0x13   :  { %131 = vmatpush1.bf16.msra.mxu0 %v770_v10 }
  0x14   :  { %132 = vmatprep.subr.bf16.mxu0 %v771_v11 }
  0x17   :  { %133 = vmatpush1.bf16.msra.mxu0 %v773_v12 }
  0x18   :  { %134 = vmatprep.subr.bf16.mxu0 %v774_v13 }
  0x1b   :  { %135 = vmatpush1.bf16.msra.mxu0 %v776_v14  ;;  %v785_v14 = vld [vmem:[%s962_s2 + $0xa0] ss:$8 sps:$4 sm:$0xff]  }
  0x1c   :  { %136 = vmatprep.subr.bf16.mxu0 %v777_v15  ;;  %v786_v15 = vld [vmem:[%s962_s2 + $0xb0] ss:$8 sps:$4 sm:$0xff]  }
  0x1f   :  { %137 = vmatpush1.bf16.msra.mxu0 %v779_v16 }
  0x20   :  { %688 = vmatprep.subr.bf16.mxu0 %v788_v18 }
  0x22   :  { %155 = vmatmul.mubr.bf16.vlgmr.msra.gmra.mrb[0].mxu0 %v780_v17 }
  0x23   :  { %690 = vmatprep.mubr.msk.bf16.mxu0 %vm789_vm0, %v788_v18 }
  0xf5   :  { %v156_v20 = vpop.f32.mrb[0].mxu0 }
  0xf6   :  { %v172_v21 = vadd.f32 %v647_v19, %v156_v20  ;;  %v158_v22 = vpop.f32.mrb[1].mxu0 }
  0xf7   :  { %307 = vrot.lane.b32.xlu1 %v158_v22, %s790_s25  ;;  %v160_v23 = vpop.f32.mrb[2].mxu0 }
  0xf8   :  { %v173_v24 = vadd.f32 %v647_v19, %v160_v23  ;;  %227 = vrot.lane.b32.xlu0 %v172_v21, %s790_s25  ;;  %v162_v25 = vpop.f32.mrb[3].mxu0 }
  0xfa   :  { %v174_v26 = vpack.c.bf16 %v173_v24, %v172_v21 }
  0xfb   :  { %309 = vrot.lane.b32.xlu1 %v162_v25, %s790_s25 }
  0xfc   :  { %229 = vrot.lane.b32.xlu0 %v173_v24, %s790_s25  ;;  %689 = vmatpush3.bf16.msra.mxu0 %v174_v26 }
  0xfd   :  { %694 = vmatprep.subr.bf16.mxu0 %v788_v18 }
  0xff   :  { %691 = vmatmul.mubr.msk.bf16.vlgmr.msra.gmra.mrb[4].mxu0 %vm180_vm1, %v884_v27  ;;  %363 = vrot.lane.b32.xlu1 %v782_v28, %s790_s25 }
 0x100   :  { %361 = vrot.lane.b32.xlu0 %v783_v29, %s790_s25  ;;  %695 = vmatpush3.bf16.msra.mxu0 %v783_v29 }
 0x101   :  { %696 = vmatprep.subr.bf16.mxu0 %v788_v18  ;;  %698 = vmatprep.mubr.msk.bf16.mxu0 %vm789_vm0, %v788_v18 }
 0x103   :  { %416 = vrot.lane.b32.xlu1 %v158_v22, %s791_s7 }
 0x104   :  { %368 = vrot.lane.b32.xlu0 %v650_v30, %s790_s25  ;;  %697 = vmatpush3.bf16.msra.mxu0 %v782_v28 }
 0x105   :  { %722 = vmatprep.subr.bf16.mxu0 %v788_v18 }
 0x108   :  { %418 = vrot.lane.b32.xlu0 %v162_v25, %s791_s7 }
 0x169   :  { %v308_v47 = vpop.permute.xlu1 %307 }
 0x16a   :  { %v228_v32 = vpop.permute.xlu0 %227 }
 0x16d   :  { %v310_v53 = vpop.permute.xlu1 %309 }
 0x16e   :  { %v230_v40 = vpop.permute.xlu0 %229 }
 0x171   :  { %v364_v55 = vpop.permute.xlu1 %363 }
 0x172   :  { %v362_v54 = vpop.permute.xlu0 %361 }
 0x175   :  { %v417_v16 = vpop.permute.xlu1 %416 }
 0x176   :  { %v369_v8 = vpop.permute.xlu0 %368 }
 0x17a   :  { %v419_v21 = vpop.permute.xlu0 %418 }
 0x1d2   :  { %v218_v33 = vpop.f32.mrb[4].mxu0 }
 0x1d3   :  { %v219_v34 = vadd.f32 %v218_v33, %v158_v22  ;;  %v692_v35 = vpop.f32.mrb[5].mxu0 }
 0x1d4   :  { %v221_v36 = vpop.f32.mrb[6].mxu0 }
 0x1d5   :  { %v233_v37 = vadd.f32 %v228_v32, %v219_v34  ;;  %v222_v38 = vadd.f32 %v221_v36, %v162_v25  ;;  %v693_v39 = vpop.f32.mrb[7].mxu0 }
 0x1d6   :  { %v549_v39 = vld [vmem:[%s965_s1] sm:$0xf] }
 0x1d7   :  { %v234_v41 = vadd.f32 %v230_v40, %v222_v38  ;;  %v235_v42 = vmax.f32 %v233_v37, 0.0  ;;  %v551_v38 = vld [vmem:[#allocation2 + $0x8] sm:$0xff]  ;;  %v661_v40 = vld [vmem:[%s964_s3 + $0x2] ss:$0 sm:$0xff] }
 0x1d9   :  { %v236_v43 = vmax.f32 %v234_v41, 0.0 }
 0x1db   :  { %v237_v44 = vpack.c.bf16 %v236_v43, %v235_v42 }
 0x1dd   :  { %699 = vmatmul.mubr.msk.bf16.vlgmr.msra.gmra.mrb[8].mxu0 %vm259_vm2, %v237_v44 }
 0x1de   :  { %726 = vmatprep.mubr.msk.bf16.mxu0 %vm789_vm0, %v788_v18  ;;  %723 = vmatpush3.bf16.msra.mxu0 %v785_v14 }
 0x1df   :  { %724 = vmatprep.subr.bf16.mxu0 %v788_v18 }
 0x1e2   :  { %725 = vmatpush3.bf16.msra.mxu0 %v786_v15 }
 0x2b0   :  { %v297_v45 = vpop.f32.mrb[8].mxu0 }
 0x2b1   :  { %v700_v46 = vpop.f32.mrb[9].mxu0  ;;  %v298_v49 = vadd.f32 %v650_v30, %v297_v45  ;;  %v662_v45 = vld [vmem:[%s964_s3 + $0x3] ss:$0 sm:$0xff] }
 0x2b2   :  { %v300_v48 = vpop.f32.mrb[10].mxu0 }
 0x2b3   :  { %v301_v50 = vadd.f32 %v650_v30, %v300_v48  ;;  %v701_v51 = vpop.f32.mrb[11].mxu0  ;;  %v663_v48 = vld [vmem:[%s964_s3 + $0x4] ss:$0 sm:$0xff] }
 0x2b5   :  { %v304_v52 = vpack.c.bf16 %v301_v50, %v298_v49 }
 0x2b7   :  { %703 = vmatpush3.bf16.msra.mxu1 %v304_v52 }
 0x2b8   :  { %708 = vmatprep.subr.bf16.mxu1 %v788_v18 }
 0x2ba   :  { %705 = vmatmul.mubr.msk.bf16.vlgmr.msra.gmra.mrb[0].mxu1 %vm180_vm1, %v884_v27 }
 0x2bb   :  { %709 = vmatpush3.bf16.msra.mxu1 %v362_v54  ;;  %712 = vmatprep.mubr.msk.bf16.mxu1 %vm789_vm0, %v788_v18 }
 0x2bc   :  { %710 = vmatprep.subr.bf16.mxu1 %v788_v18 }
 0x2bf   :  { %711 = vmatpush3.bf16.msra.mxu1 %v364_v55 }
 0x2c0   :  { %716 = vmatprep.subr.bf16.mxu1 %v788_v18 }
 0x38d   :  { %v347_v56 = vpop.f32.mrb[0].mxu1 }
 0x38e   :  { %v348_v57 = vadd.f32 %v347_v56, %v308_v47  ;;  %v706_v58 = vpop.f32.mrb[1].mxu1 }
 0x38f   :  { %v350_v59 = vpop.f32.mrb[2].mxu1 }
 0x390   :  { %v354_v60 = vadd.f32 %v348_v57, %v235_v42  ;;  %v351_v61 = vadd.f32 %v350_v59, %v310_v53  ;;  %v707_v62 = vpop.f32.mrb[3].mxu1 }
 0x392   :  { %v356_v63 = vmax.f32 %v354_v60, 0.0  ;;  %v355_v0 = vadd.f32 %v351_v61, %v236_v43 }
 0x394   :  { %v357_v2 = vmax.f32 %v355_v0, 0.0  ;;  %v358_v3 = vadd.f32 %v356_v63, %v235_v42 }
 0x396   :  { %v359_v4 = vadd.f32 %v357_v2, %v236_v43 }
 0x398   :  { %v360_v5 = vpack.c.bf16 %v359_v4, %v358_v3 }
 0x39a   :  { %713 = vmatmul.mubr.msk.bf16.vlgmr.msra.gmra.mrb[4].mxu1 %vm259_vm2, %v360_v5 }
 0x39b   :  { %718 = vmatprep.mubr.msk.bf16.mxu1 %vm789_vm0, %v788_v18 }
 0x46d   :  { %v408_v6 = vpop.f32.mrb[4].mxu1 }
 0x46e   :  { %v714_v7 = vpop.f32.mrb[5].mxu1  ;;  %v409_v10 = vadd.f32 %v408_v6, %v369_v8 }
 0x46f   :  { %v411_v9 = vpop.f32.mrb[6].mxu1 }
 0x470   :  { %v412_v11 = vadd.f32 %v411_v9, %v369_v8  ;;  %v715_v12 = vpop.f32.mrb[7].mxu1 }
 0x472   :  { %v415_v13 = vpack.c.bf16 %v412_v11, %v409_v10 }
 0x474   :  { %717 = vmatpush3.bf16.msra.mxu1 %v415_v13 }
 0x475   :  { %730 = vmatprep.subr.bf16.mxu1 %v788_v18 }
 0x477   :  { %719 = vmatmul.mubr.msk.bf16.vlgmr.msra.gmra.mrb[8].mxu1 %vm180_vm1, %v884_v27 }
 0x478   :  { %746 = vmatprep.mubr.msk.bf16.mxu1 %vm789_vm0, %v788_v18 }
 0x54a   :  { %v456_v17 = vpop.f32.mrb[8].mxu1 }
 0x54b   :  { %v457_v19 = vadd.f32 %v456_v17, %v417_v16  ;;  %v720_v20 = vpop.f32.mrb[9].mxu1 }
 0x54c   :  { %v459_v22 = vpop.f32.mrb[10].mxu1 }
 0x54d   :  { %v463_v23 = vadd.f32 %v457_v19, %v358_v3  ;;  %v460_v24 = vadd.f32 %v459_v22, %v419_v21  ;;  %v721_v25 = vpop.f32.mrb[11].mxu1 }
 0x54f   :  { %v465_v26 = vmax.f32 %v463_v23, 0.0  ;;  %v464_v27 = vadd.f32 %v460_v24, %v359_v4 }
 0x551   :  { %v466_v28 = vmax.f32 %v464_v27, 0.0  ;;  %v467_v29 = vadd.f32 %v465_v26, %v358_v3 }
 0x553   :  { %v468_v30 = vadd.f32 %v466_v28, %v359_v4 }
 0x555   :  { %v469_v31 = vpack.c.bf16 %v468_v30, %v467_v29 }
 0x557   :  { %727 = vmatmul.mubr.msk.bf16.vlgmr.msra.gmra.mrb[12].mxu0 %vm259_vm2, %v469_v31 }
 0x62a   :  { %v523_v32 = vpop.f32.mrb[12].mxu0 }
 0x62b   :  { %v728_v33 = vpop.f32.mrb[13].mxu0 }
 0x62c   :  { %v526_v34 = vpop.f32.mrb[14].mxu0 }
 0x62d   :  { %v538_v35 = vpack.c.bf16 %v526_v34, %v523_v32  ;;  %v729_v36 = vpop.f32.mrb[15].mxu0 }
 0x62f   :  { %539 = vst.msk [vmem:[#allocation2] sm:$0xff] %vm259_vm2, %v538_v35 }
 0x636   :  { %v550_v37 = vld [vmem:[#allocation2] sm:$0xff] }
 0x637   :  { %731 = vmatpush3.bf16.msra.mxu1 %v550_v37 }
 0x638   :  { %732 = vmatprep.subr.bf16.mxu1 %v788_v18 }
 0x63b   :  { %733 = vmatpush3.bf16.msra.mxu1 %v551_v38 }
 0x63c   :  { %734 = vmatprep.subr.bf16.mxu1 %v788_v18 }
 0x63f   :  { %735 = vmatpush3.bf16.msra.mxu1 %v787_v1 }
 0x640   :  { %736 = vmatprep.subr.bf16.mxu1 %v788_v18 }
 0x643   :  { %737 = vmatpush3.bf16.msra.mxu1 %v787_v1 }
 0x644   :  { %738 = vmatprep.subr.bf16.mxu1 %v788_v18 }
 0x647   :  { %739 = vmatpush3.bf16.msra.mxu1 %v787_v1 }
 0x648   :  { %740 = vmatprep.subr.bf16.mxu1 %v788_v18 }
 0x64b   :  { %741 = vmatpush3.bf16.msra.mxu1 %v787_v1 }
 0x64c   :  { %742 = vmatprep.subr.bf16.mxu1 %v788_v18 }
 0x64f   :  { %743 = vmatpush3.bf16.msra.mxu1 %v787_v1 }
 0x650   :  { %744 = vmatprep.subr.bf16.mxu1 %v788_v18 }
 0x653   :  { %745 = vmatpush3.bf16.msra.mxu1 %v787_v1 }
 0x656   :  { %747 = vmatmul.mubr.bf16.vlgmr.msra.gmra.mrb[12].mxu1 %v549_v39 }
 0x729   :  { %v592_v41 = vpop.f32.mrb[12].mxu1 }
 0x72a   :  { %v603_v42 = vadd.f32 %v661_v40, %v592_v41  ;;  %v748_v43 = vpop.f32.mrb[13].mxu1 }
 0x72b   :  { %v595_v44 = vpop.f32.mrb[14].mxu1 }
 0x72c   :  { %v604_v18 = vmax.f32 %v603_v42, 0.0  ;;  %v749_v46 = vpop.f32.mrb[15].mxu1 }
 0x72e   :  { %v610_v1 = vmul.f32 %v662_v45, %v604_v18 }
 0x730   :  { %v611_v47 = vsel %vm259_vm2, %v610_v1, 0.0 }
 0x731   :  { %612 = vadd.xlane.f32.xlu1 %v611_v47 }
 0x7be   :  { %v613_v49 = vpop.xlane.xlu1 %612 }
 0x7bf   :  { %v619_v50 = vadd.f32 %v663_v48, %v613_v49 }
 0x7c1   :  { %622 = vperm.xlu0 %755, %v619_v50  }
 0x840   :  { %v623_v51 = vpop.permute.xlu0 %622 }
 0x841   :  { %625 = vst [vmem:[%s966_s4] sm:$0xff] %v623_v51 }

</bundles_post_ra>
